<compile_context>
chip_gen: v5e
topology: v5e:2x2
jax: 0.10.0
libtpu: 0.0.40
codegen_flags: <defaults>
</compile_context>

<pallas_src>
import functools
import math

import jax
import jax.numpy as jnp
from jax import lax
from jax.experimental import pallas as pl
from jax.experimental.pallas import tpu as pltpu


def _patch_merge_kernel(a_ref, b_ref, wa_ref, wb_ref, cs_ref, bias_ref, o_ref, *,
                        eps, matmul_dtype):
    """Fused 2x2 gather + LayerNorm(4C) + Linear(4C->2C, no bias) on one tile.

    a_ref:    (th, Wh, 2C)  [x0 | x2] channels per merged token (even image row)
    b_ref:    (th, Wh, 2C)  [x1 | x3] channels per merged token (odd image row)
    wa_ref:   (2C, 2C)  gamma-folded reduction-weight rows for the a channels
    wb_ref:   (2C, 2C)  gamma-folded reduction-weight rows for the b channels
    cs_ref:   (1, 2C)   column sums of the full gamma-folded weight (mean removal)
    bias_ref: (1, 2C)   beta @ W^T (LN shift folded through the linear layer)
    o_ref:    (th*Wh, 2C)
    """
    th, wh, twoc = a_ref.shape
    rows = th * wh

    # Collapse (th, Wh) -> rows.  Free re-tiling when Wh % 8 == 0 (the common
    # Swin case in this script); TODO(synk): switch to a rank-3 dot_general once
    # Mosaic supports it, to avoid the sublane relayout when Wh % 8 != 0.
    a = a_ref[...].reshape(rows, twoc)          # [x0 | x2], input dtype
    b = b_ref[...].reshape(rows, twoc)          # [x1 | x3]

    # LayerNorm statistics in f32 (single pass: sum and sum-of-squares).
    a_f = a.astype(jnp.float32)
    b_f = b.astype(jnp.float32)
    inv_n = 1.0 / (2.0 * twoc)                  # 1 / (4C)
    s1 = jnp.sum(a_f, axis=-1, keepdims=True) + jnp.sum(b_f, axis=-1, keepdims=True)
    s2 = (jnp.sum(a_f * a_f, axis=-1, keepdims=True)
          + jnp.sum(b_f * b_f, axis=-1, keepdims=True))
    mean = s1 * inv_n                           # (rows, 1)
    var = s2 * inv_n - mean * mean
    inv = lax.rsqrt(var + eps)                  # (rows, 1)

    # Raw activations go straight to the MXU; explicit accumulate so the second
    # dot can accumulate into the MXU result buffer (MRB) on v7x.
    acc = jnp.dot(a.astype(matmul_dtype), wa_ref[...],
                  preferred_element_type=jnp.float32)
    acc = acc + jnp.dot(b.astype(matmul_dtype), wb_ref[...],
                        preferred_element_type=jnp.float32)

    # Post-matmul normalization:
    #   out = inv * (x @ Wg - mean * colsum(Wg)) + beta @ W^T
    out = inv * (acc - mean * cs_ref[...]) + bias_ref[...]
    o_ref[...] = out.astype(o_ref.dtype)


def _default_vmem_limit_bytes():
    """Generation-aware VMEM budget (48 MiB on v7x, ~100 MiB on 128-MiB parts)."""
    cap = None
    try:
        info = pltpu.get_tpu_info()
        cap = getattr(info, "vmem_capacity_bytes", None)
    except Exception:
        cap = None
    if not cap:
        cap = 64 * 1024 * 1024          # conservative (v7x-sized) fallback
    return int(min(cap - 16 * 1024 * 1024, 100 * 1024 * 1024))


def _pick_h_tile(n_hrows, wh, c, x_itemsize, out_itemsize, mm_itemsize, vmem_budget):
    """Pick the h-row tile size (cdiv grid, clipped tail block)."""
    cout = 2 * c
    # Grid-invariant operands (Wa, Wb, colsum, bias) are single-buffered.
    const_bytes = 2 * (2 * c * cout * mm_itemsize) + 2 * (cout * 4)
    budget = max(vmem_budget - const_bytes, 1 << 20)
    # Per h-row: double-buffered a/b input slabs, f32 stats pass, matmul-dtype
    # copies, f32 accumulator + double-buffered output block.
    per_hrow = (wh * 4 * c) * (2 * x_itemsize + 4 + mm_itemsize) \
             + (wh * cout) * (4 + 2 * out_itemsize)
    cap = max(int(budget // per_hrow), 1)
    cap = min(cap, max(8192 // max(wh, 1), 1), n_hrows)

    # The (th*Wh, 2C) output block must be sublane-aligned.
    align = 8 // math.gcd(wh, 8)

    # Prefer >=4 grid steps (2 per TensorCore on v7x megacore), else >=2, else 1.
    if n_hrows >= 4 * align:
        pref_steps = 4
    elif n_hrows >= 2 * align:
        pref_steps = 2
    else:
        pref_steps = 1
    th = min(cap, -(-n_hrows // pref_steps))
    if th >= align:
        th = (th // align) * align       # round down: stay inside the VMEM budget
    else:
        th = min(align, n_hrows)
    th = max(min(th, n_hrows), 1)

    # Nudge to an even step count (megacore balance) when cheaply possible.
    def _steps(t):
        return -(-n_hrows // t)
    s = _steps(th)
    if s > 1 and s % 2 == 1:
        t = -(-n_hrows // (s + 1))
        t = max((t // align) * align, min(align, n_hrows))
        if t >= 1 and _steps(t) % 2 == 0:
            th = t
    return th


def patch_merging_forward(x, gamma, beta, w_red, *, input_resolution,
                          matmul_dtype=jnp.bfloat16, vmem_limit_bytes=None):
    """Pallas implementation of Swin PatchMerging.forward.

    Args:
      x:      (B, H*W, C)
      gamma:  (4*C,) LayerNorm weight
      beta:   (4*C,) LayerNorm bias
      w_red:  (2*C, 4*C) nn.Linear weight (torch convention, bias=False)
    Returns:
      (B, H*W//4, 2*C) with x.dtype
    """
    H, W = input_resolution
    B, L, C = x.shape
    assert L == H * W, "input feature has wrong size"
    assert H % 2 == 0 and W % 2 == 0, f"x size ({H}*{W}) are not even."
    Hh, Wh = H // 2, W // 2
    Cout = 2 * C

    if vmem_limit_bytes is None:
        vmem_limit_bytes = _default_vmem_limit_bytes()

    # Free row-major view: row r = b*Hh + hb pairs image rows 2hb / 2hb+1.
    #   x4[r, 0, w] -> channels [x0 | x2] of merged token (b, hb, w)
    #   x4[r, 1, w] -> channels [x1 | x3]
    x4 = x.reshape(B * Hh, 2, Wh, 2 * C)

    # Fold LayerNorm affine into the reduction weight (tiny O(C^2) work) and
    # permute its rows to the channel order the fused gather delivers.
    # LayerNorm statistics are permutation invariant, so this is exact.
    w_t = jnp.transpose(w_red).astype(jnp.float32)              # (4C, 2C)
    wg = gamma.astype(jnp.float32)[:, None] * w_t                # gamma folded
    bias = (beta.astype(jnp.float32) @ w_t).reshape(1, Cout)     # beta folded
    colsum = jnp.sum(wg, axis=0).reshape(1, Cout)                # for mean removal
    wa = jnp.concatenate([wg[0:C], wg[2 * C:3 * C]], axis=0).astype(matmul_dtype)
    wb = jnp.concatenate([wg[C:2 * C], wg[3 * C:4 * C]], axis=0).astype(matmul_dtype)

    n_hrows = B * Hh
    th = _pick_h_tile(
        n_hrows, Wh, C,
        x_itemsize=jnp.dtype(x.dtype).itemsize,
        out_itemsize=jnp.dtype(x.dtype).itemsize,
        mm_itemsize=jnp.dtype(matmul_dtype).itemsize,
        vmem_budget=max(int(vmem_limit_bytes) - 8 * 1024 * 1024, 1 << 20))
    n_steps = -(-n_hrows // th)          # cdiv; Pallas clips the tail block
    total_rows = n_hrows * Wh

    kernel = functools.partial(_patch_merge_kernel, eps=1e-5, matmul_dtype=matmul_dtype)

    def _const_spec(shape):
        idx = lambda i: (0,) * len(shape)
        try:   # single-buffer grid-invariant operands (halves their VMEM footprint)
            return pl.BlockSpec(shape, idx, pipeline_mode=pl.Buffered(1))
        except TypeError:
            return pl.BlockSpec(shape, idx)

    in_specs = [
        # even / odd image-row halves of the same free view; DMAs are disjoint
        pl.BlockSpec((th, pl.Squeezed(), Wh, 2 * C), lambda i: (i, 0, 0, 0)),
        pl.BlockSpec((th, pl.Squeezed(), Wh, 2 * C), lambda i: (i, 1, 0, 0)),
        _const_spec((2 * C, Cout)),     # Wa (gamma folded)
        _const_spec((2 * C, Cout)),     # Wb (gamma folded)
        _const_spec((1, Cout)),         # colsum(Wg)
        _const_spec((1, Cout)),         # beta @ W^T
    ]

    # NOTE: for stage-1 Swin (C=96) the output lane width 2C=192 is not a
    # multiple of 128 -> partially masked stores; prefer 2C % 128 == 0 when the
    # channel count is negotiable.
    out_flat = pl.pallas_call(
        kernel,
        out_shape=jax.ShapeDtypeStruct((total_rows, Cout), x.dtype),
        grid_spec=pltpu.PrefetchScalarGridSpec(
            num_scalar_prefetch=0,
            grid=(n_steps,),
            in_specs=in_specs,
            out_specs=pl.BlockSpec((th * Wh, Cout), lambda i: (i, 0)),
        ),
        compiler_params=pltpu.CompilerParams(
            dimension_semantics=("parallel",),
            vmem_limit_bytes=int(vmem_limit_bytes)),
    )(x4, x4, wa, wb, colsum, bias)

    return out_flat.reshape(B, Hh * Wh, Cout)


def _reference(x, gamma, beta, w_red, *, input_resolution):
    """Pure-JAX reference matching the PyTorch module semantics (f32)."""
    H, W = input_resolution
    B, L, C = x.shape
    xv = x.reshape(B, H, W, C)
    x0 = xv[:, 0::2, 0::2, :]
    x1 = xv[:, 1::2, 0::2, :]
    x2 = xv[:, 0::2, 1::2, :]
    x3 = xv[:, 1::2, 1::2, :]
    xm = jnp.concatenate([x0, x1, x2, x3], -1).reshape(B, -1, 4 * C)
    mean = jnp.mean(xm, axis=-1, keepdims=True)
    var = jnp.mean((xm - mean) ** 2, axis=-1, keepdims=True)
    xn = (xm - mean) / jnp.sqrt(var + 1e-5) * gamma + beta
    return xn @ w_red.T


if __name__ == "__main__":
    # Small shapes consistent with the module: B=2, H=W=16, dim=C=4
    B, H, W, C = 2, 16, 16, 4
    key = jax.random.PRNGKey(0)
    kx, kw, kg, kb = jax.random.split(key, 4)

    x = jax.random.normal(kx, (B, H * W, C), dtype=jnp.float32)
    # nn.Linear(4*dim, 2*dim, bias=False) -> weight (2C, 4C)
    w_red = jax.random.normal(kw, (2 * C, 4 * C), dtype=jnp.float32) * 0.05
    # LayerNorm(4*dim) params; perturb away from identity so they matter
    gamma = 1.0 + 0.1 * jax.random.normal(kg, (4 * C,), dtype=jnp.float32)
    beta = 0.1 * jax.random.normal(kb, (4 * C,), dtype=jnp.float32)

    ref = _reference(x, gamma, beta, w_red, input_resolution=(H, W))

    # f32 matmul path: matches the PyTorch module to f32 rounding.
    fwd_f32 = jax.jit(functools.partial(
        patch_merging_forward, input_resolution=(H, W), matmul_dtype=jnp.float32))
    out_f32 = jax.block_until_ready(fwd_f32(x, gamma, beta, w_red))
    assert out_f32.shape == (B, H * W // 4, 2 * C), out_f32.shape
    assert jnp.allclose(out_f32, ref, atol=1e-4, rtol=1e-4), float(
        jnp.max(jnp.abs(out_f32 - ref)))

    # Default path: bf16 MXU matmul with f32 accumulation (fast path on v6e/v7x;
    # results differ from the f32 module at the ~1e-3 level).
    fwd_bf16 = jax.jit(functools.partial(
        patch_merging_forward, input_resolution=(H, W)))
    out_bf16 = jax.block_until_ready(fwd_bf16(x, gamma, beta, w_red))
    assert out_bf16.shape == (B, H * W // 4, 2 * C), out_bf16.shape
    assert jnp.allclose(out_bf16, ref, atol=2e-2, rtol=2e-2), float(
        jnp.max(jnp.abs(out_bf16 - ref)))

    print("KERNEL_OK")
</pallas_src>

<mosaic_0001>
module attributes {stable_mosaic.version = 11 : i64} {
  func.func @_patch_merge_kernel(%arg0: i32, %arg1: memref<4x1x8x8xf32, #tpu.memory_space<vmem>>, %arg2: memref<4x1x8x8xf32, #tpu.memory_space<vmem>>, %arg3: memref<8x8xf32, #tpu.memory_space<vmem>>, %arg4: memref<8x8xf32, #tpu.memory_space<vmem>>, %arg5: memref<1x8xf32, #tpu.memory_space<vmem>>, %arg6: memref<1x8xf32, #tpu.memory_space<vmem>>, %arg7: memref<32x8xf32, #tpu.memory_space<vmem>>) attributes {dimension_semantics = [#tpu.dimension_semantics<parallel>], iteration_bounds = array<i64: 4>, scalar_prefetch = 0 : i64, scratch_operands = 0 : i64, tpu.core_type = #tpu.core_type<tc>, window_params = [{transform_indices = @transform_0, window_bounds = array<i64: 4, 1, 8, 8>}, {transform_indices = @transform_1, window_bounds = array<i64: 4, 1, 8, 8>}, {pipeline_mode = #tpu.pipeline_mode<synchronous>, transform_indices = @transform_2, window_bounds = array<i64: 8, 8>}, {pipeline_mode = #tpu.pipeline_mode<synchronous>, transform_indices = @transform_3, window_bounds = array<i64: 8, 8>}, {pipeline_mode = #tpu.pipeline_mode<synchronous>, transform_indices = @transform_4, window_bounds = array<i64: 1, 8>}, {pipeline_mode = #tpu.pipeline_mode<synchronous>, transform_indices = @transform_5, window_bounds = array<i64: 1, 8>}, {transform_indices = @transform_6, window_bounds = array<i64: 32, 8>}]} {
    %c0 = arith.constant 0 : index
    %c0_0 = arith.constant 0 : index
    %c0_1 = arith.constant 0 : index
    %c0_2 = arith.constant 0 : index
    %0 = vector.load %arg1[%c0, %c0_0, %c0_1, %c0_2] : memref<4x1x8x8xf32, #tpu.memory_space<vmem>>, vector<4x1x8x8xf32>
    %1 = vector.shape_cast %0 : vector<4x1x8x8xf32> to vector<4x8x8xf32>
    %2 = vector.shape_cast %1 : vector<4x8x8xf32> to vector<32x8xf32>
    %c0_3 = arith.constant 0 : index
    %c0_4 = arith.constant 0 : index
    %c0_5 = arith.constant 0 : index
    %c0_6 = arith.constant 0 : index
    %3 = vector.load %arg2[%c0_3, %c0_4, %c0_5, %c0_6] : memref<4x1x8x8xf32, #tpu.memory_space<vmem>>, vector<4x1x8x8xf32>
    %4 = vector.shape_cast %3 : vector<4x1x8x8xf32> to vector<4x8x8xf32>
    %5 = vector.shape_cast %4 : vector<4x8x8xf32> to vector<32x8xf32>
    %cst = arith.constant dense<0.000000e+00> : vector<32xf32>
    %6 = vector.multi_reduction <add>, %2, %cst [1] : vector<32x8xf32> to vector<32xf32>
    %7 = vector.shape_cast %6 : vector<32xf32> to vector<32x1xf32>
    %cst_7 = arith.constant dense<0.000000e+00> : vector<32xf32>
    %8 = vector.multi_reduction <add>, %5, %cst_7 [1] : vector<32x8xf32> to vector<32xf32>
    %9 = vector.shape_cast %8 : vector<32xf32> to vector<32x1xf32>
    %10 = arith.addf %7, %9 : vector<32x1xf32>
    %11 = arith.mulf %2, %2 : vector<32x8xf32>
    %cst_8 = arith.constant dense<0.000000e+00> : vector<32xf32>
    %12 = vector.multi_reduction <add>, %11, %cst_8 [1] : vector<32x8xf32> to vector<32xf32>
    %13 = vector.shape_cast %12 : vector<32xf32> to vector<32x1xf32>
    %14 = arith.mulf %5, %5 : vector<32x8xf32>
    %cst_9 = arith.constant dense<0.000000e+00> : vector<32xf32>
    %15 = vector.multi_reduction <add>, %14, %cst_9 [1] : vector<32x8xf32> to vector<32xf32>
    %16 = vector.shape_cast %15 : vector<32xf32> to vector<32x1xf32>
    %17 = arith.addf %13, %16 : vector<32x1xf32>
    %cst_10 = arith.constant 6.250000e-02 : f32
    %18 = vector.broadcast %cst_10 : f32 to vector<32x1xf32>
    %19 = arith.mulf %10, %18 : vector<32x1xf32>
    %cst_11 = arith.constant 6.250000e-02 : f32
    %20 = vector.broadcast %cst_11 : f32 to vector<32x1xf32>
    %21 = arith.mulf %17, %20 : vector<32x1xf32>
    %22 = arith.mulf %19, %19 : vector<32x1xf32>
    %23 = arith.subf %21, %22 : vector<32x1xf32>
    %cst_12 = arith.constant 9.99999974E-6 : f32
    %24 = vector.broadcast %cst_12 : f32 to vector<32x1xf32>
    %25 = arith.addf %23, %24 : vector<32x1xf32>
    %26 = math.rsqrt %25 : vector<32x1xf32>
    %c0_13 = arith.constant 0 : index
    %c0_14 = arith.constant 0 : index
    %27 = vector.load %arg3[%c0_13, %c0_14] : memref<8x8xf32, #tpu.memory_space<vmem>>, vector<8x8xf32>
    %cst_15 = arith.constant dense<0.000000e+00> : vector<32x8xf32>
    %28 = tpu.matmul %2, %27, %cst_15 {dimension_numbers = #tpu.dot_dimension_numbers<[1], [0], [0], [1], [0, 0, 1, 1], [], []>} : vector<32x8xf32>, vector<8x8xf32>, vector<32x8xf32> -> vector<32x8xf32>
    %c0_16 = arith.constant 0 : index
    %c0_17 = arith.constant 0 : index
    %29 = vector.load %arg4[%c0_16, %c0_17] : memref<8x8xf32, #tpu.memory_space<vmem>>, vector<8x8xf32>
    %cst_18 = arith.constant dense<0.000000e+00> : vector<32x8xf32>
    %30 = tpu.matmul %5, %29, %cst_18 {dimension_numbers = #tpu.dot_dimension_numbers<[1], [0], [0], [1], [0, 0, 1, 1], [], []>} : vector<32x8xf32>, vector<8x8xf32>, vector<32x8xf32> -> vector<32x8xf32>
    %31 = arith.addf %28, %30 : vector<32x8xf32>
    %c0_19 = arith.constant 0 : index
    %c0_20 = arith.constant 0 : index
    %32 = vector.load %arg5[%c0_19, %c0_20] : memref<1x8xf32, #tpu.memory_space<vmem>>, vector<1x8xf32>
    %33 = vector.broadcast %19 : vector<32x1xf32> to vector<32x8xf32>
    %34 = vector.broadcast %32 : vector<1x8xf32> to vector<32x8xf32>
    %35 = arith.mulf %33, %34 : vector<32x8xf32>
    %36 = arith.subf %31, %35 : vector<32x8xf32>
    %37 = vector.broadcast %26 : vector<32x1xf32> to vector<32x8xf32>
    %38 = arith.mulf %37, %36 : vector<32x8xf32>
    %c0_21 = arith.constant 0 : index
    %c0_22 = arith.constant 0 : index
    %39 = vector.load %arg6[%c0_21, %c0_22] : memref<1x8xf32, #tpu.memory_space<vmem>>, vector<1x8xf32>
    %40 = vector.broadcast %39 : vector<1x8xf32> to vector<32x8xf32>
    %41 = arith.addf %38, %40 : vector<32x8xf32>
    %c0_23 = arith.constant 0 : index
    %c0_24 = arith.constant 0 : index
    %42 = vector.load %arg7[%c0_23, %c0_24] : memref<32x8xf32, #tpu.memory_space<vmem>>, vector<32x8xf32>
    tpu.vector_store %arg7[%c0_23, %c0_24], %41 {strides = array<i32>} : memref<32x8xf32, #tpu.memory_space<vmem>>, vector<32x8xf32>,
    return
  }
  func.func @transform_0(%arg0: i32) -> (i32, i32, i32, i32) {
    %c0_i32 = arith.constant 0 : i32
    %c0_i32_0 = arith.constant 0 : i32
    %c0_i32_1 = arith.constant 0 : i32
    %c0_i32_2 = arith.constant 0 : i32
    return %arg0, %c0_i32, %c0_i32_0, %c0_i32_1 : i32, i32, i32, i32
  }
  func.func @transform_1(%arg0: i32) -> (i32, i32, i32, i32) {
    %c1_i32 = arith.constant 1 : i32
    %c0_i32 = arith.constant 0 : i32
    %c0_i32_0 = arith.constant 0 : i32
    %c0_i32_1 = arith.constant 0 : i32
    return %arg0, %c1_i32, %c0_i32, %c0_i32_0 : i32, i32, i32, i32
  }
  func.func @transform_2(%arg0: i32) -> (i32, i32) {
    %c0_i32 = arith.constant 0 : i32
    %c0_i32_0 = arith.constant 0 : i32
    %c0_i32_1 = arith.constant 0 : i32
    return %c0_i32, %c0_i32_0 : i32, i32
  }
  func.func @transform_3(%arg0: i32) -> (i32, i32) {
    %c0_i32 = arith.constant 0 : i32
    %c0_i32_0 = arith.constant 0 : i32
    %c0_i32_1 = arith.constant 0 : i32
    return %c0_i32, %c0_i32_0 : i32, i32
  }
  func.func @transform_4(%arg0: i32) -> (i32, i32) {
    %c0_i32 = arith.constant 0 : i32
    %c0_i32_0 = arith.constant 0 : i32
    %c0_i32_1 = arith.constant 0 : i32
    return %c0_i32, %c0_i32_0 : i32, i32
  }
  func.func @transform_5(%arg0: i32) -> (i32, i32) {
    %c0_i32 = arith.constant 0 : i32
    %c0_i32_0 = arith.constant 0 : i32
    %c0_i32_1 = arith.constant 0 : i32
    return %c0_i32, %c0_i32_0 : i32, i32
  }
  func.func @transform_6(%arg0: i32) -> (i32, i32) {
    %c0_i32 = arith.constant 0 : i32
    %c0_i32_0 = arith.constant 0 : i32
    return %arg0, %c0_i32 : i32, i32
  }
}

</mosaic_0001>

<bundles_post_ra>
// kernel: patch_merging_forward.1
= control target key start
LH: loop header
LB: loop body
LE: loop exit
PB: predicated region body
PF: predicated region fallthrough
CT: control target
= control target key end

     0   :  { %s829_s21 = smov 0   ;;  %s831_s22 = smov 0   ;;  %s954_s0 = inlined_call_operand.vmem [shape: f32[16,2,8,8], index: 0, kind: input, shape index: {}, may-alias: {0,1}]   ;;  %s955_s1 = inlined_call_operand.vmem [shape: f32[16,2,8,8], index: 1, kind: input, shape index: {}, may-alias: {0,1}]   ;;  %s956_s2 = inlined_call_operand.vmem [shape: f32[8,8], index: 2, kind: input, shape index: {}]   ;;  %s957_s3 = inlined_call_operand.vmem [shape: f32[8,8], index: 3, kind: input, shape index: {}]   ;;  %s958_s4 = inlined_call_operand.vmem [shape: f32[1,8], index: 4, kind: input, shape index: {}]   ;;  %s959_s5 = inlined_call_operand.vmem [shape: f32[1,8], index: 5, kind: input, shape index: {}]   ;;  %s960_s6 = inlined_call_operand.vmem [shape: f32[128,8], index: 6, kind: output, shape index: {}]  }
   0x1   :  { %s833_s23 = smov 0  }
   0x2 LB: > { %s701_s24 = sadd.s32 4294967295, %s792_s23   ;;  %s846_s25 = sadd.s32 1, %s792_s23   ;;  %s792_s23 = sphi %s833_s23, %s964_s23   ;;  %s788_s22 = sphi %s831_s22, %s963_s22   ;;  %s784_s21 = sphi %s829_s21, %s962_s21  }
   0x3   : > { %s20_s26 = ssub.s32 %s792_s23, %s846_s25  ;;  %s23_s27 = sadd.s32 1, %s788_s22 }
   0x4   : > { %p21_p0 = scmp.eq.s32.totalorder %s20_s26, 0  ;;  %p30_p1 = scmp.ne.s32.totalorder %s788_s22, %s784_s21 }
   0x5   : > { %p31_p2 = scmp.eq.s32.totalorder %s792_s23, 0  ;;  %p704_p4 = scmp.ge.s32.totalorder %s792_s23, 4 }
   0x6   : > { %s855_s28 = scalar_select %p21_p0, %s788_s22, %s23_s27  }
   0x7   : > { %p857_p3 = por %p31_p2, %p30_p1  ;;  %204 = sbr.rel (%p704_p4) target bundleno = 28 (0x1c), region = 32 }
   0xc   : > { %207 = sbr.rel (!%p857_p3) target bundleno = 20 (0x14), region = 36  ;;  %s209_s30 = sand.u32 (%p857_p3), 1, %s788_s22  }
   0xd   : > { %s732_s7 = sshll.u32 (%p857_p3), %s792_s23, 6  ;;  %s705_s8 = sshll.u32 (%p857_p3), %s209_s30, 5 }
   0xe   : > { %s215_s11 = scalar_lea.vmem (%p857_p3), %s954_s0, %s732_s7  ;;  %s211_s12 = scalar_lea.vmem (%p857_p3), [#allocation2], %s705_s8 }
   0xf   : > { %v250_v0 = vld [vmem:[%s215_s11] sm:$0xff] (%p857_p3)  ;;  %v252_v1 = vld [vmem:[%s215_s11 + $0x10] sm:$0xff] (%p857_p3) }
  0x10   : > { %v254_v2 = vld [vmem:[%s215_s11 + $0x20] sm:$0xff] (%p857_p3)  ;;  %251 = vst [vmem:[%s211_s12] sm:$0xff] (%p857_p3), %v250_v0  ;;  %v256_v3 = vld [vmem:[%s215_s11 + $0x30] sm:$0xff] (%p857_p3) }
  0x11   : > { %253 = vst [vmem:[%s211_s12 + $0x8] sm:$0xff] %v252_v1 }
  0x12   : > { %255 = vst [vmem:[%s211_s12 + $0x10] sm:$0xff] %v254_v2 }
  0x13   : > { %257 = vst [vmem:[%s211_s12 + $0x18] sm:$0xff] %v256_v3 }
  0x14 PF: > { %263 = sbr.rel (!%p857_p3) target bundleno = 28 (0x1c), region = 74  ;;  %s265_s13 = sand.u32 (%p857_p3), 1, %s788_s22  }
  0x15   : > { %s733_s14 = sshll.u32 (%p857_p3), %s792_s23, 6  ;;  %s709_s15 = sshll.u32 (%p857_p3), %s265_s13, 5 }
  0x16   : > { %s649_s18 = scalar_lea.vmem (%p857_p3), %s955_s1, %s733_s14  ;;  %s267_s19 = scalar_lea.vmem (%p857_p3), [#allocation3], %s709_s15 }
  0x17   : > { %v712_v4 = vld [vmem:[%s649_s18 + $0x8] sm:$0xff] (%p857_p3)  ;;  %v713_v5 = vld [vmem:[%s649_s18 + $0x18] sm:$0xff] (%p857_p3) }
  0x18   : > { %v714_v6 = vld [vmem:[%s649_s18 + $0x28] sm:$0xff] (%p857_p3)  ;;  %308 = vst [vmem:[%s267_s19] sm:$0xff] (%p857_p3), %v712_v4  ;;  %v715_v7 = vld [vmem:[%s649_s18 + $0x38] sm:$0xff] (%p857_p3) }
  0x19   : > { %310 = vst [vmem:[%s267_s19 + $0x8] sm:$0xff] %v713_v5 }
  0x1a   : > { %312 = vst [vmem:[%s267_s19 + $0x10] sm:$0xff] %v714_v6 }
  0x1b   : > { %314 = vst [vmem:[%s267_s19 + $0x18] sm:$0xff] %v715_v7 }
  0x1c PF: > { %p716_p5 = scmp.ge.s32.totalorder %s792_s23, 1  ;;  %p319_p6 = scmp.lt.s32.totalorder %s792_s23, 5 }
  0x1e   : > { %p320_p7 = pnand %p716_p5, %p319_p6 }
  0x1f   : > { %s326_s30 = sand.u32 (!%p320_p7), 1, %s784_s21   ;;  %s719_s21 = sshll.u32 (!%p320_p7), %s701_s24, 2 }
  0x20   : > { %323 = sbr.rel (%p320_p7) target bundleno = 230 (0xe6), region = 112  ;;  %s717_s7 = sshll.u32 (!%p320_p7), %s326_s30, 5 }
  0x21   : > { %s335_s8 = scalar_lea.vmem (!%p320_p7), [#allocation3], %s717_s7  ;;  %s328_s9 = scalar_lea.vmem (!%p320_p7), [#allocation2], %s717_s7 }
  0x22   : > { %p369_p8 = scmp.lt.s32.totalorder (!%p320_p7), %s719_s21, 15 }
  0x25   : > { %v508_v8 = vld [vmem:[%s957_s3] sm:$0xff]  ;;  %vm382_vm0 = vcmask 64512   ;;  %v380_v11 = vld [vmem:[%s335_s8 + $0x10] sm:$0xff]  ;;  %v379_v17 = vld [vmem:[%s335_s8 + $0x8] sm:$0xff]  ;;  %s966_s21 = smov (!%p369_p8, %s719_s21), 15 }
  0x26   : > { %v507_v9 = vld [vmem:[%s956_s2] sm:$0xff]  ;;  %536 = vmatpush.msra.mxu0 %v508_v8  ;;  %734 = vmatpush.msra.mxu2 %v508_v8  ;;  %v376_v13 = vld [vmem:[%s328_s9 + $0x10] sm:$0xff]  ;;  %v377_v18 = vld [vmem:[%s328_s9 + $0x18] sm:$0xff]  ;;  %v398_v21 = vsel %vm382_vm0, %v379_v17, 0.0  ;;  %v401_v27 = vsel %vm382_vm0, %v380_v11, 0.0  ;;  %v428_v34 = vmul.f32 %v379_v17, %v379_v17  ;;  %v429_v35 = vmul.f32 %v380_v11, %v380_v11  ;;  %s720_s23 = sshll.u32 %s966_s21, 3 }
  0x27   : > { %577 = vmatpush.msra.mxu1 %v507_v9  ;;  %735 = vmatpush.msra.mxu3 %v507_v9  ;;  %v378_v10 = vld [vmem:[%s335_s8] sm:$0xff]  ;;  %v389_v16 = vsel %vm382_vm0, %v376_v13, 0.0  ;;  %v381_v19 = vld [vmem:[%s335_s8 + $0x18] sm:$0xff]  ;;  %v375_v20 = vld [vmem:[%s328_s9 + $0x8] sm:$0xff]  ;;  %v392_v22 = vsel %vm382_vm0, %v377_v18, 0.0  ;;  %v413_v28 = vmul.f32 %v376_v13, %v376_v13  ;;  %v414_v29 = vmul.f32 %v377_v18, %v377_v18  ;;  %s372_s15 = scalar_lea.vmem %s960_s6, %s720_s23 }
  0x28   : > { %v374_v12 = vld [vmem:[%s328_s9] sm:$0xff]  ;;  %721 = vmatmul.msk.f32.vlgmr.msra.gmra.mxu0 %vm382_vm0, %v378_v10  ;;  %723 = vmatmul.msk.f32.vlgmr.msra.gmra.mxu2 %vm382_vm0, %v380_v11  ;;  %v395_v14 = vsel %vm382_vm0, %v378_v10, 0.0  ;;  %v386_v23 = vsel %vm382_vm0, %v375_v20, 0.0  ;;  %v404_v25 = vsel %vm382_vm0, %v381_v19, 0.0  ;;  %v412_v30 = vmul.f32 %v375_v20, %v375_v20 }
  0x29   : > { %v383_v15 = vsel %vm382_vm0, %v374_v12, 0.0  ;;  %725 = vmatmul.msk.f32.vlgmr.msra.gmra.mxu1 %vm382_vm0, %v374_v12  ;;  %727 = vmatmul.msk.f32.vlgmr.msra.gmra.mxu3 %vm382_vm0, %v376_v13  ;;  %v411_v24 = vmul.f32 %v374_v12, %v374_v12  ;;  %v421_v31 = vsel %vm382_vm0, %v413_v28, 0.0  ;;  %v424_v32 = vsel %vm382_vm0, %v414_v29, 0.0  ;;  %v760_v28 = vld [vmem:[%s958_s4] ss:$0 sm:$0xff] }
  0x2a   : > { %396 = vadd.xlane.f32.xlu2 %v395_v14  ;;  %390 = vadd.xlane.f32.xlu1 %v389_v16  ;;  %v418_v33 = vsel %vm382_vm0, %v412_v30, 0.0  ;;  %v427_v36 = vmul.f32 %v378_v10, %v378_v10  ;;  %v434_v37 = vsel %vm382_vm0, %v428_v34, 0.0  ;;  %v437_v38 = vsel %vm382_vm0, %v429_v35, 0.0 }
  0x2b   : > { %384 = vadd.xlane.f32.xlu0 %v383_v15  ;;  %v415_v26 = vsel %vm382_vm0, %v411_v24, 0.0  ;;  %v430_v40 = vmul.f32 %v381_v19, %v381_v19 }
  0x2c   : > { %v431_v39 = vsel %vm382_vm0, %v427_v36, 0.0 }
  0x2d   : > { %v440_v41 = vsel %vm382_vm0, %v430_v40, 0.0 }
  0x30   : > { %722 = vmatmul.msk.f32.gmra.mxu0 %vm382_vm0, %v379_v17  ;;  %724 = vmatmul.msk.f32.gmra.mxu2 %vm382_vm0, %v381_v19 }
  0x31   : > { %726 = vmatmul.msk.f32.gmra.mxu1 %vm382_vm0, %v375_v20  ;;  %728 = vmatmul.msk.f32.gmra.mxu3 %vm382_vm0, %v377_v18 }
  0x32   : > { %399 = vadd.xlane.f32.xlu2 %v398_v21  ;;  %393 = vadd.xlane.f32.xlu1 %v392_v22 }
  0x33   : > { %387 = vadd.xlane.f32.xlu0 %v386_v23 }
  0x3a   : > { %405 = vadd.xlane.f32.xlu1 %v404_v25  ;;  %416 = vadd.xlane.f32.xlu2 %v415_v26 }
  0x3b   : > { %402 = vadd.xlane.f32.xlu0 %v401_v27 }
  0x42   : > { %422 = vadd.xlane.f32.xlu1 %v421_v31  ;;  %425 = vadd.xlane.f32.xlu2 %v424_v32 }
  0x43   : > { %419 = vadd.xlane.f32.xlu0 %v418_v33 }
  0x4a   : > { %435 = vadd.xlane.f32.xlu1 %v434_v37  ;;  %438 = vadd.xlane.f32.xlu2 %v437_v38 }
  0x4b   : > { %432 = vadd.xlane.f32.xlu0 %v431_v39 }
  0x53   : > { %441 = vadd.xlane.f32.xlu0 %v440_v41 }
  0x9d   : > { %v397_v42 = vpop.xlane.xlu2 %396  ;;  %v391_v43 = vpop.xlane.xlu1 %390 }
  0x9e   : > { %v385_v44 = vpop.xlane.xlu0 %384 }
  0x9f   : > { %v407_v56 = vadd.f32 %v397_v42, %v385_v44 }
  0xa1   : > { %v447_v59 = vmul.f32 0.0625, %v407_v56 }
  0xa3   : > { %v455_v6 = vmul.f32 %v447_v59, %v447_v59  ;;  %v595_v39 = vmul.f32 %v760_v28, %v447_v59 }
  0xa5   : > { %v400_v45 = vpop.xlane.xlu2 %399  ;;  %v394_v46 = vpop.xlane.xlu1 %393 }
  0xa6   : > { %v388_v47 = vpop.xlane.xlu0 %387  ;;  %v538_v14 = vpop.f32.mrf.mxu0 }
  0xa7   : > { %v408_v54 = vadd.f32 %v400_v45, %v388_v47  ;;  %v579_v15 = vpop.f32.mrf.mxu1 }
  0xa8   : > { %v580_v47 = vadd.f32 %v579_v15, %v538_v14 }
  0xa9   : > { %v448_v57 = vmul.f32 0.0625, %v408_v54 }
  0xaa   : > { %v599_v59 = vsub.f32 %v580_v47, %v595_v39 }
  0xab   : > { %v456_v2 = vmul.f32 %v448_v57, %v448_v57  ;;  %v544_v29 = vpop.f32.mrf.mxu2 }
  0xac   : > { %v585_v30 = vpop.f32.mrf.mxu3 }
  0xad   : > { %v406_v48 = vpop.xlane.xlu1 %405  ;;  %v417_v49 = vpop.xlane.xlu2 %416  ;;  %v586_v40 = vadd.f32 %v585_v30, %v544_v29 }
  0xae   : > { %v403_v50 = vpop.xlane.xlu0 %402  ;;  %v410_v7 = vadd.f32 %v406_v48, %v394_v46  ;;  %v541_v32 = vpop.f32.mrf.mxu0  ;;  %v596_v46 = vmul.f32 %v760_v28, %v448_v57 }
  0xaf   : > { %v409_v55 = vadd.f32 %v403_v50, %v391_v43  ;;  %v582_v33 = vpop.f32.mrf.mxu1 }
  0xb0   : > { %v909_v16 = vmul.f32 0.0625, %v410_v7  ;;  %v583_v41 = vadd.f32 %v582_v33, %v541_v32 }
  0xb1   : > { %v449_v58 = vmul.f32 0.0625, %v409_v55 }
  0xb2   : > { %v458_v20 = vmul.f32 %v909_v16, %v909_v16 }
  0xb3   : > { %v457_v3 = vmul.f32 %v449_v58, %v449_v58  ;;  %v597_v43 = vmul.f32 %v760_v28, %v449_v58 }
  0xb5   : > { %v423_v51 = vpop.xlane.xlu1 %422  ;;  %v426_v52 = vpop.xlane.xlu2 %425  ;;  %v601_v56 = vsub.f32 %v586_v40, %v597_v43 }
  0xb6   : > { %v420_v53 = vpop.xlane.xlu0 %419 }
  0xbd   : > { %v436_v60 = vpop.xlane.xlu1 %435  ;;  %v439_v61 = vpop.xlane.xlu2 %438 }
  0xbe   : > { %v444_v62 = vadd.f32 %v436_v60, %v420_v53  ;;  %v445_v63 = vadd.f32 %v439_v61, %v423_v51  ;;  %v433_v0 = vpop.xlane.xlu0 %432  ;;  %v761_v53 = vld [vmem:[%s959_s5] ss:$0 sm:$0xff]  ;;  %v547_v60 = vpop.f32.mrf.mxu2 }
  0xbf   : > { %v443_v1 = vadd.f32 %v433_v0, %v417_v49  ;;  %v588_v61 = vpop.f32.mrf.mxu3 }
  0xc0   : > { %v452_v4 = vmul.f32 0.0625, %v444_v62  ;;  %v453_v5 = vmul.f32 0.0625, %v445_v63 }
  0xc1   : > { %v451_v8 = vmul.f32 0.0625, %v443_v1 }
  0xc2   : > { %v460_v9 = vsub.f32 %v452_v4, %v456_v2  ;;  %v461_v10 = vsub.f32 %v453_v5, %v457_v3 }
  0xc3   : > { %v459_v11 = vsub.f32 %v451_v8, %v455_v6  ;;  %v589_v6 = vadd.f32 %v588_v61, %v547_v60 }
  0xc4   : > { %v464_v12 = vadd.f32 1e-05, %v460_v9  ;;  %v465_v13 = vadd.f32 1e-05, %v461_v10  ;;  %v598_v10 = vmul.f32 %v760_v28, %v909_v16 }
  0xc5   : > { %v911_v17 = vadd.f32 1e-05, %v459_v11 }
  0xc6   : > { %762 = vrsqrt.f32 %v464_v12  ;;  %v442_v18 = vpop.xlane.xlu0 %441  ;;  %vm483_vm3 = vweird.f32 %v464_v12  ;;  %vm493_vm6 = vweird.f32 %v465_v13 }
  0xc7   : > { %764 = vrsqrt.f32 %v465_v13  ;;  %v446_v19 = vadd.f32 %v442_v18, %v426_v52  ;;  %v600_v52 = vsub.f32 %v583_v41, %v596_v46  ;;  %vm473_vm8 = vweird.f32 %v911_v17 }
  0xc8   : > { %766 = vrsqrt.f32 %v911_v17 }
  0xc9   : > { %v454_v21 = vmul.f32 0.0625, %v446_v19 }
  0xcb   : > { %v462_v22 = vsub.f32 %v454_v21, %v458_v20 }
  0xcc   : > { %v763_v23 = vpop.eup %762 }
  0xcd   : > { %v765_v24 = vpop.eup %764  ;;  %v478_v25 = vmul.f32 %v763_v23, %v464_v12  ;;  %v918_v26 = vadd.f32 1e-05, %v462_v22  ;;  %vm484_vm1 = vweird.f32 %v763_v23  ;;  %v602_v12 = vsub.f32 %v589_v6, %v598_v10 }
  0xce   : > { %v767_v27 = vpop.eup %766  ;;  %v488_v31 = vmul.f32 %v765_v24, %v465_v13  ;;  %vm494_vm2 = vweird.f32 %v765_v24  ;;  %vm485_vm5 = vmor %vm483_vm3, %vm484_vm1 }
  0xcf   : > { %v479_v34 = vmul.f32 %v763_v23, %v478_v25  ;;  %v468_v35 = vmul.f32 %v767_v27, %v911_v17  ;;  %768 = vrsqrt.f32 %v918_v26  ;;  %vm474_vm4 = vweird.f32 %v767_v27  ;;  %vm495_vm7 = vmor %vm493_vm6, %vm494_vm2 }
  0xd0   : > { %v489_v36 = vmul.f32 %v765_v24, %v488_v31  ;;  %vm475_vm9 = vmor %vm473_vm8, %vm474_vm4  ;;  %vm503_vm11 = vweird.f32 %v918_v26 }
  0xd1   : > { %v480_v37 = vmul.f32 0.5, %v479_v34  ;;  %v469_v38 = vmul.f32 %v767_v27, %v468_v35 }
  0xd2   : > { %v490_v42 = vmul.f32 0.5, %v489_v36 }
  0xd3   : > { %v481_v44 = vsub.f32 1.5, %v480_v37  ;;  %v470_v45 = vmul.f32 0.5, %v469_v38 }
  0xd4   : > { %v491_v48 = vsub.f32 1.5, %v490_v42 }
  0xd5   : > { %v769_v49 = vpop.eup %768  ;;  %v482_v50 = vmul.f32 %v763_v23, %v481_v44  ;;  %v471_v51 = vsub.f32 1.5, %v470_v45 }
  0xd6   : > { %v492_v54 = vmul.f32 %v765_v24, %v491_v48  ;;  %v498_v55 = vmul.f32 %v769_v49, %v918_v26  ;;  %vm504_vm10 = vweird.f32 %v769_v49 }
  0xd7   : > { %v486_v57 = vsel %vm485_vm5, %v763_v23, %v482_v50  ;;  %v472_v58 = vmul.f32 %v767_v27, %v471_v51  ;;  %vm505_vm12 = vmor %vm503_vm11, %vm504_vm10 }
  0xd8   : > { %v604_v62 = vmul.f32 %v600_v52, %v486_v57  ;;  %v496_v63 = vsel %vm495_vm7, %v765_v24, %v492_v54  ;;  %v499_v0 = vmul.f32 %v769_v49, %v498_v55 }
  0xd9   : > { %v605_v1 = vmul.f32 %v601_v56, %v496_v63  ;;  %v476_v2 = vsel %vm475_vm9, %v767_v27, %v472_v58 }
  0xda   : > { %v612_v3 = vadd.f32 %v761_v53, %v604_v62  ;;  %v603_v4 = vmul.f32 %v599_v59, %v476_v2  ;;  %v500_v5 = vmul.f32 0.5, %v499_v0 }
  0xdb   : > { %v613_v7 = vadd.f32 %v761_v53, %v605_v1 }
  0xdc   : > { %616 = vst.msk [vmem:[%s372_s15 + $0x8] sm:$0xff] %vm382_vm0, %v612_v3  ;;  %v611_v8 = vadd.f32 %v761_v53, %v603_v4  ;;  %v501_v9 = vsub.f32 1.5, %v500_v5 }
  0xdd   : > { %617 = vst.msk [vmem:[%s372_s15 + $0x10] sm:$0xff] %vm382_vm0, %v613_v7 }
  0xde   : > { %615 = vst.msk [vmem:[%s372_s15] sm:$0xff] %vm382_vm0, %v611_v8  ;;  %v502_v11 = vmul.f32 %v769_v49, %v501_v9 }
  0xe0   : > { %v506_v13 = vsel %vm505_vm12, %v769_v49, %v502_v11 }
  0xe1   : > { %v606_v14 = vmul.f32 %v602_v12, %v506_v13 }
  0xe3   : > { %v614_v15 = vadd.f32 %v761_v53, %v606_v14 }
  0xe5   : > { %618 = vst.msk [vmem:[%s372_s15 + $0x18] sm:$0xff] %vm382_vm0, %v614_v15 }
  0xe6 PF: > { %p13_p9 = scmp.ge.s32.totalorder %s846_s25, 6   ;;  %s962_s21 = smov %s788_s22 }
  0xe7   : > { %s963_s22 = smov %s855_s28  ;;  %s964_s23 = smov %s846_s25 }
  0xe8   :  { %15 = sbr.rel (!%p13_p9) target bundleno = 2 (0x2), region = 163 }

</bundles_post_ra>
